<compile_context>
chip_gen: v7x
topology: tpu7x:2x2x1
jax: 0.10.0
libtpu: 0.0.40
codegen_flags: <defaults>
</compile_context>

<pallas_src>
import functools
import math

import jax
import jax.numpy as jnp
from jax.experimental import pallas as pl
from jax.experimental.pallas import tpu as pltpu

DROPOUT_RATE = 0.1
N_SAMPLES = 5
_EPS = 1e-10
_LANE_CHOICES = (1024, 512, 256, 128)
_BLOCK_BYTES = 2 << 20   # ~2 MiB of f32 per array per block
_MIN_TILES = 8           # aim for >= 8 grid steps on large tensors (megacore)


# --------------------------------------------------------------------------
# Small integer helpers (portable, tiling-invariant hashing).
# --------------------------------------------------------------------------
def _i32(v):
    """Python int (possibly >= 2**31) -> wrapped int32 scalar constant."""
    v &= 0xFFFFFFFF
    if v >= 1 << 31:
        v -= 1 << 32
    return jnp.int32(v)


def _shr(v, k):
    """Logical right shift on int32."""
    return jax.lax.shift_right_logical(v, jnp.int32(k))


def _hash32(elem, seed):
    """One well-mixed 32-bit hash per element (murmur-style finalizer)."""
    h = elem ^ (seed * _i32(0x27D4EB2F) + _i32(0x9E3779B9))
    h = h ^ _shr(h, 16)
    h = h * _i32(0x85EBCA6B)
    h = h ^ _shr(h, 13)
    h = h * _i32(0xC2B2AE35)
    h = h ^ _shr(h, 16)
    return h


def _binomial_thresholds(n_samples, dropout_rate):
    """CDF thresholds c_1 <= ... <= c_n (23-bit) such that for a uniform
    u in [0, 2^23), cnt(u) = #{k : u >= c_k} is distributed Binomial(n, 1-p)."""
    n = int(n_samples)
    p = float(dropout_rate)
    q = 1.0 - p
    pmf = [math.comb(n, j) * (q ** j) * (p ** (n - j)) for j in range(n + 1)]
    thresholds = []
    cdf = 0.0
    for k in range(1, n + 1):
        cdf += pmf[k - 1]                      # P(X <= k-1)
        c = int(round(cdf * (1 << 23)))
        thresholds.append(min(max(c, 0), 1 << 23))
    return tuple(thresholds)


def _keep_count(elem, seed, thresholds):
    """Per-element keep count cnt ~ Binomial(n, 1-p), int32 accumulation."""
    u = _hash32(elem, seed) & jnp.int32(0x7FFFFF)      # 23-bit uniform, >= 0
    cnt = jnp.zeros(elem.shape, jnp.int32)
    for c in thresholds:                               # unrolled, n_samples small
        cnt = cnt + (u >= jnp.int32(c)).astype(jnp.int32)
    return cnt


def _elementwise_stats(x, elem, seed, thresholds, n_samples, dropout_rate,
                       apply_dropout):
    """Shared math used both inside the kernel and for the jnp tail path."""
    if not apply_dropout:
        # Faithful eval semantics: nn.Dropout is the identity, so every sample
        # equals x -> mean == x, unbiased variance == 0, exactly.
        return x, jnp.full_like(x, _EPS)
    cnt = _keep_count(elem, seed, thresholds).astype(jnp.float32)
    n = float(n_samples)
    xs = x * (1.0 / (1.0 - dropout_rate))              # value of every kept sample
    mean = xs * (cnt * (1.0 / n))
    # Unbiased variance of {keep_i * xs}; exactly 0 when all samples agree.
    # torch.var would give NaN for n_samples == 1 -- we return 0 instead.
    var_coeff = 1.0 / (n * float(max(n_samples - 1, 1)))
    var = (xs * xs) * (cnt * (n - cnt)) * var_coeff
    return mean, var + _EPS


# --------------------------------------------------------------------------
# Pallas kernel.
# --------------------------------------------------------------------------
def _uncertainty_kernel(seed_ref, x_ref, mean_ref, unc_ref, *,
                        n_samples, dropout_rate, thresholds, apply_dropout):
    x = x_ref[...]

    if not apply_dropout:
        mean_ref[...] = x
        unc_ref[...] = jnp.full_like(x, _EPS)
        return

    rows, lanes = x_ref.shape                          # static tile shape
    # Global flat element index -> masks independent of tiling (int32 is safe:
    # the wrapper rejects tensors with >= 2^31 elements).
    base = pl.program_id(0) * (rows * lanes)
    r_iota = jax.lax.broadcasted_iota(jnp.int32, (rows, lanes), 0)
    c_iota = jax.lax.broadcasted_iota(jnp.int32, (rows, lanes), 1)
    elem = base + r_iota * lanes + c_iota

    mean, unc = _elementwise_stats(x, elem, seed_ref[0], thresholds,
                                   n_samples, dropout_rate, True)
    mean_ref[...] = mean
    unc_ref[...] = unc


# --------------------------------------------------------------------------
# Tiling plan.
# --------------------------------------------------------------------------
def _plan_layout(total):
    """Return (main, lanes): `main` is the 128-aligned prefix routed through the
    kernel with the widest dividing lane width; total - main (< 128) is the
    plain-jnp tail.  No padding, no extra full-tensor copies."""
    for lanes in _LANE_CHOICES:
        if total >= lanes and total % lanes == 0:
            return total, lanes
    main = (total // 128) * 128
    if main == 0:
        return 0, 128
    for lanes in _LANE_CHOICES:
        if main % lanes == 0:
            return main, lanes
    return main, 128


def _choose_tile_rows(rows, lanes, tile_rows=None):
    """Rows per block: ~2 MiB of f32 per array (multiple of 8 sublanes).
    (1 input + 2 outputs) * 2 pipeline buffers * 2 MiB = 12 MiB VMEM, inside the
    v5e 16 MiB scoped default and comfortable on v6e/v7x.  Ensure >= 2 grid
    steps (>= 8 for large tensors) so v7x megacore can shard the parallel axis."""
    if tile_rows is not None:
        t = max(8, (int(tile_rows) // 8) * 8)
        return rows if t >= rows else t
    budget = max(8, (_BLOCK_BYTES // (4 * lanes) // 8) * 8)
    if rows <= 8:
        return rows                                    # single full-height block
    target_tiles = _MIN_TILES if rows >= _MIN_TILES * 64 else 2
    per_tile = -(-rows // target_tiles)                # ceil
    per_tile = max(8, ((per_tile + 7) // 8) * 8)
    return min(budget, per_tile)


def _run_kernel(x2d, seed_arr, *, n_samples, dropout_rate, thresholds,
                apply_dropout, tile_rows):
    rows, lanes = x2d.shape
    kernel = functools.partial(
        _uncertainty_kernel,
        n_samples=n_samples,
        dropout_rate=dropout_rate,
        thresholds=thresholds,
        apply_dropout=apply_dropout,
    )
    # index_maps receive the scalar-prefetch ref as a trailing positional arg.
    block = pl.BlockSpec((tile_rows, lanes), lambda i, seed_ref: (i, 0))
    grid_spec = pltpu.PrefetchScalarGridSpec(
        num_scalar_prefetch=1,                         # seed -> SMEM
        grid=(pl.cdiv(rows, tile_rows),),
        in_specs=[block],
        out_specs=(block, block),
    )
    return pl.pallas_call(
        kernel,
        out_shape=(
            jax.ShapeDtypeStruct((rows, lanes), jnp.float32),
            jax.ShapeDtypeStruct((rows, lanes), jnp.float32),
        ),
        grid_spec=grid_spec,
        compiler_params=pltpu.CompilerParams(
            # Row tiles are fully independent -> double-buffered pipeline and
            # megacore sharding on v7x.
            dimension_semantics=("parallel",)),
    )(seed_arr, x2d)


# --------------------------------------------------------------------------
# Public wrapper (== UncertaintyModule.forward).
# --------------------------------------------------------------------------
def uncertainty_forward(x, seed=0, *, training=False, apply_dropout=False,
                        dropout_rate=DROPOUT_RATE, n_samples=N_SAMPLES,
                        use_fast_eval_path=True, tile_rows=None):
    """JAX/Pallas equivalent of UncertaintyModule.forward.

    Returns (mean, uncertainty) with x's shape.  The default path reproduces
    the PyTorch eval semantics exactly (dropout is a no-op in eval mode);
    apply_dropout=True enables the intended MC-dropout behaviour.
    """
    x = jnp.asarray(x, dtype=jnp.float32)
    if training:
        return x, jnp.zeros_like(x)

    if not apply_dropout and use_fast_eval_path:
        # Eval-mode nn.Dropout is the identity: mean == x, var == 0 exactly.
        # Skips the kernel and all of its HBM traffic.
        return x, jnp.full_like(x, _EPS)

    if apply_dropout and not (0.0 <= float(dropout_rate) < 1.0):
        raise ValueError("dropout_rate must be in [0, 1)")
    if int(n_samples) < 1:
        raise ValueError("n_samples must be >= 1")

    orig_shape = x.shape
    flat = x.reshape(-1)
    total = int(flat.shape[0])
    if total == 0:
        return x, jnp.full_like(x, _EPS)
    if total >= (1 << 31):
        # int32 element indices would wrap -> correlated dropout masks.
        raise ValueError("tensor too large for int32 element indexing")

    n_samples = int(n_samples)
    dropout_rate = float(dropout_rate)
    thresholds = (_binomial_thresholds(n_samples, dropout_rate)
                  if apply_dropout else ())

    s = int(seed) & 0xFFFFFFFF
    if s >= 1 << 31:
        s -= 1 << 32
    seed_arr = jnp.asarray([s], dtype=jnp.int32)

    main, lanes = _plan_layout(total)
    parts_mean, parts_unc = [], []

    if main:
        rows = main // lanes
        x2d = (flat if main == total else flat[:main]).reshape(rows, lanes)
        t_rows = _choose_tile_rows(rows, lanes, tile_rows)
        m2d, u2d = _run_kernel(
            x2d, seed_arr,
            n_samples=n_samples,
            dropout_rate=dropout_rate,
            thresholds=thresholds,
            apply_dropout=bool(apply_dropout),
            tile_rows=t_rows)
        parts_mean.append(m2d.reshape(-1))
        parts_unc.append(u2d.reshape(-1))

    if main < total:
        # < 128 trailing elements: same math, plain jnp, identical randoms
        # (hash of the same global flat indices).
        x_tail = flat[main:]
        elem = main + jnp.arange(total - main, dtype=jnp.int32)
        tm, tu = _elementwise_stats(x_tail, elem, seed_arr[0], thresholds,
                                    n_samples, dropout_rate,
                                    bool(apply_dropout))
        parts_mean.append(tm)
        parts_unc.append(tu)

    mean = parts_mean[0] if len(parts_mean) == 1 else jnp.concatenate(parts_mean)
    unc = parts_unc[0] if len(parts_unc) == 1 else jnp.concatenate(parts_unc)
    return mean.reshape(orig_shape), unc.reshape(orig_shape)


def _reference(x, seed, *, apply_dropout, dropout_rate=DROPOUT_RATE,
               n_samples=N_SAMPLES):
    """Pure-jnp reference using the exact same hash / statistics."""
    x = jnp.asarray(x, dtype=jnp.float32)
    flat = x.reshape(-1)
    elem = jnp.arange(flat.shape[0], dtype=jnp.int32)
    th = (_binomial_thresholds(n_samples, dropout_rate)
          if apply_dropout else ())
    m, u = _elementwise_stats(flat, elem, jnp.int32(seed), th,
                              int(n_samples), float(dropout_rate),
                              bool(apply_dropout))
    return m.reshape(x.shape), u.reshape(x.shape)


if __name__ == "__main__":
    key = jax.random.PRNGKey(0)
    x = jax.random.normal(key, (2, 4, 16, 16), dtype=jnp.float32)  # NCHW

    # 1) Faithful PyTorch eval semantics via the analytic fast path.
    mean, unc = uncertainty_forward(x)
    jax.block_until_ready((mean, unc))
    assert mean.shape == x.shape and unc.shape == x.shape
    assert bool(jnp.array_equal(mean, x))
    assert bool(jnp.allclose(unc, _EPS, atol=1e-12))

    # 2) Same exact semantics, forced through the Pallas kernel.
    mean_k, unc_k = uncertainty_forward(x, use_fast_eval_path=False)
    jax.block_until_ready((mean_k, unc_k))
    assert bool(jnp.array_equal(mean_k, x))
    assert bool(jnp.allclose(unc_k, _EPS, atol=1e-12))

    # 3) MC-dropout kernel with p=0 must reduce to the eval result
    #    (exercises the binomial count path end to end).
    mean0, unc0 = uncertainty_forward(x, seed=7, apply_dropout=True,
                                      dropout_rate=0.0)
    jax.block_until_ready((mean0, unc0))
    assert bool(jnp.allclose(mean0, x, atol=1e-6))
    assert bool(jnp.allclose(unc0, _EPS, atol=1e-7))

    # 4) Active MC dropout (intended behaviour) + pure-jnp reference match.
    mean_mc, unc_mc = uncertainty_forward(x, seed=123, apply_dropout=True)
    ref_m, ref_u = _reference(x, 123, apply_dropout=True)
    jax.block_until_ready((mean_mc, unc_mc, ref_m, ref_u))
    scale = 1.0 / (1.0 - DROPOUT_RATE)
    assert bool(jnp.all(jnp.isfinite(mean_mc)))
    assert bool(jnp.all(jnp.isfinite(unc_mc)))
    assert bool(jnp.all(unc_mc >= _EPS))
    assert bool(jnp.all(jnp.abs(mean_mc) <= jnp.abs(x) * scale + 1e-6))
    assert bool(jnp.any(unc_mc > 1e-8))   # some elements were actually dropped
    assert bool(jnp.allclose(mean_mc, ref_m, rtol=1e-6, atol=1e-6))
    assert bool(jnp.allclose(unc_mc, ref_u, rtol=1e-6, atol=1e-6))

    # 5) Tiling invariance: multi-tile grid (with a ragged last block) must
    #    reproduce the single-block result (randoms are global-index hashed).
    x_big = jax.random.normal(jax.random.PRNGKey(1), (2, 5, 32, 32),
                              dtype=jnp.float32)
    a_mean, a_unc = uncertainty_forward(x_big, seed=3, apply_dropout=True,
                                        tile_rows=16)  # single full block
    b_mean, b_unc = uncertainty_forward(x_big, seed=3, apply_dropout=True,
                                        tile_rows=8)   # 2 blocks, ragged last
    jax.block_until_ready((a_mean, a_unc, b_mean, b_unc))
    assert bool(jnp.allclose(a_mean, b_mean, rtol=1e-6, atol=1e-6))
    assert bool(jnp.allclose(a_unc, b_unc, rtol=1e-6, atol=1e-6))

    # 6) Ragged sizes: kernel-on-prefix + jnp tail must equal the pure-jnp
    #    reference (no padding copies anywhere).
    x_rag = jax.random.normal(jax.random.PRNGKey(2), (2, 3, 50),
                              dtype=jnp.float32)       # 300 = 256 + 44
    r_mean, r_unc = uncertainty_forward(x_rag, seed=11, apply_dropout=True)
    e_mean, e_unc = _reference(x_rag, 11, apply_dropout=True)
    jax.block_until_ready((r_mean, r_unc, e_mean, e_unc))
    assert bool(jnp.allclose(r_mean, e_mean, rtol=1e-6, atol=1e-6))
    assert bool(jnp.allclose(r_unc, e_unc, rtol=1e-6, atol=1e-6))

    x_tiny = jax.random.normal(jax.random.PRNGKey(3), (5, 7),
                               dtype=jnp.float32)      # 35 elems, all-tail path
    t_mean, t_unc = uncertainty_forward(x_tiny, seed=5, apply_dropout=True)
    jax.block_until_ready((t_mean, t_unc))
    assert t_mean.shape == x_tiny.shape and t_unc.shape == x_tiny.shape

    # 7) Training-mode branch.
    mean_tr, unc_tr = uncertainty_forward(x, training=True)
    jax.block_until_ready((mean_tr, unc_tr))
    assert bool(jnp.array_equal(mean_tr, x))
    assert bool(jnp.allclose(unc_tr, 0.0))

    print("KERNEL_OK")
</pallas_src>

<mosaic_0001>
module attributes {stable_mosaic.version = 11 : i64} {
  func.func @_uncertainty_kernel(%arg0: i32, %arg1: memref<1xi32, #tpu.memory_space<smem>>, %arg2: memref<2x1024xf32, #tpu.memory_space<vmem>>, %arg3: memref<2x1024xf32, #tpu.memory_space<vmem>>, %arg4: memref<2x1024xf32, #tpu.memory_space<vmem>>) attributes {dimension_semantics = [#tpu.dimension_semantics<parallel>], iteration_bounds = array<i64: 1>, scalar_prefetch = 1 : i64, scratch_operands = 0 : i64, tpu.core_type = #tpu.core_type<tc>, window_params = [{transform_indices = @transform_0, window_bounds = array<i64: 2, 1024>}, {transform_indices = @transform_1, window_bounds = array<i64: 2, 1024>}, {transform_indices = @transform_2, window_bounds = array<i64: 2, 1024>}]} {
    %c0 = arith.constant 0 : index
    %c0_0 = arith.constant 0 : index
    %0 = vector.load %arg2[%c0, %c0_0] : memref<2x1024xf32, #tpu.memory_space<vmem>>, vector<2x1024xf32>
    %c0_1 = arith.constant 0 : index
    %c0_2 = arith.constant 0 : index
    %1 = vector.load %arg3[%c0_1, %c0_2] : memref<2x1024xf32, #tpu.memory_space<vmem>>, vector<2x1024xf32>
    tpu.vector_store %arg3[%c0_1, %c0_2], %0 {strides = array<i32>} : memref<2x1024xf32, #tpu.memory_space<vmem>>, vector<2x1024xf32>,
    %cst = arith.constant 1.000000e-10 : f32
    %2 = vector.broadcast %cst : f32 to vector<2x1024xf32>
    %c0_3 = arith.constant 0 : index
    %c0_4 = arith.constant 0 : index
    %3 = vector.load %arg4[%c0_3, %c0_4] : memref<2x1024xf32, #tpu.memory_space<vmem>>, vector<2x1024xf32>
    tpu.vector_store %arg4[%c0_3, %c0_4], %2 {strides = array<i32>} : memref<2x1024xf32, #tpu.memory_space<vmem>>, vector<2x1024xf32>,
    return
  }
  func.func @transform_0(%arg0: i32, %arg1: memref<1xi32, #tpu.memory_space<smem>>) -> (i32, i32) {
    %c0_i32 = arith.constant 0 : i32
    %c0_i32_0 = arith.constant 0 : i32
    return %arg0, %c0_i32 : i32, i32
  }
  func.func @transform_1(%arg0: i32, %arg1: memref<1xi32, #tpu.memory_space<smem>>) -> (i32, i32) {
    %c0_i32 = arith.constant 0 : i32
    %c0_i32_0 = arith.constant 0 : i32
    return %arg0, %c0_i32 : i32, i32
  }
  func.func @transform_2(%arg0: i32, %arg1: memref<1xi32, #tpu.memory_space<smem>>) -> (i32, i32) {
    %c0_i32 = arith.constant 0 : i32
    %c0_i32_0 = arith.constant 0 : i32
    return %arg0, %c0_i32 : i32, i32
  }
}

</mosaic_0001>

<bundles_post_ra>
// kernel: tpu_custom_call.1
= control target key start
LH: loop header
LB: loop body
LE: loop exit
PB: predicated region body
PF: predicated region fallthrough
CT: control target
= control target key end

     0   :  { %10 = vsyncpa [#allocation5], 0  ;;  %s197_s0 = inlined_call_operand.<no memory space> [shape: s32[1], index: 0, kind: input, shape index: {}]   ;;  %s198_s1 = inlined_call_operand.hbm [shape: f32[2,1024], index: 1, kind: input, shape index: {}]   ;;  %s199_s2 = inlined_call_operand.hbm [shape: f32[2,1024], index: 2, kind: output, shape index: {0}]   ;;  %s200_s3 = inlined_call_operand.hbm [shape: f32[2,1024], index: 3, kind: output, shape index: {1}]  }
   0x1   :  { %11 = vsyncpa [#allocation6], 0 }
   0x2   :  { %12 = vsyncpa [#allocation9], 0  ;;  %s137_s12 = smov [#allocation4]   ;;  %s65_s16 = scalar_lea.hbm %s198_s1, 256 }
   0x3   :  { %s19_s13 = sshll.u32 %s137_s12, 4  ;;  %p66_p0 = scmp.ne.s32.totalorder %s198_s1, %s65_s16  ;;  %s20_s13 = int_to_ptr.vmem [resolvable:$true] %s19_s13 }
   0x4   :  { %p69_p1 = scmp.lt.u32.totalorder %s65_s16, %s198_s1 }
   0x6   :  { %p71_p2 = pnand %p69_p1, %p66_p0 }
   0x8   :  { %74 = shalt.err (!%p71_p2)
}
   0x9   :  { %s75_s20 = scalar_lea.vmem %s20_s13, 256  ;;  %p80_p4 = scmp.lt.s32.totalorder %s20_s13, %s20_s13 }
   0xa   :  { %p76_p3 = scmp.ne.s32.totalorder %s20_s13, %s75_s20  ;;  %p81_p5 = scmp.lt.s32.totalorder %s75_s20, %s75_s20 }
   0xc   :  { %p82_p6 = por %p81_p5, %p80_p4 }
   0xe   :  { %p83_p7 = pnand %p82_p6, %p76_p3 }
  0x10   :  { %86 = shalt.err (!%p83_p7)
}
  0x11   :  { %22 = dma.hbm_to_vmem [thread:$0]  %s198_s1, 256, %s20_s13, [#allocation5]  }
  0x12   :  { %131 = dma.done.wait [#allocation5], 256  }
  0x13   :  { %132 = vsyncadd [#allocation5], 4294967040  ;;  %v138_v0 = vmov 1e-10   ;;  %s139_s23 = smov [#allocation8]   ;;  %s140_s25 = smov [#allocation7]  }
  0x14   :  { %30 = vst [vmem:[#allocation8] sm:$0xff] %v138_v0  ;;  %31 = vst [vmem:[#allocation8 + $0x8] sm:$0xff] %v138_v0  ;;  %s48_s24 = sshll.u32 %s139_s23, 4  ;;  %s38_s26 = sshll.u32 %s140_s25, 4  ;;  %s49_s24 = int_to_ptr.vmem [resolvable:$true] %s48_s24  ;;  %s39_s26 = int_to_ptr.vmem [resolvable:$true] %s38_s26 }
  0x15   :  { %s87_s27 = scalar_lea.vmem %s49_s24, 256  ;;  %p92_p9 = scmp.lt.s32.totalorder %s49_s24, %s49_s24 }
  0x16   :  { %p88_p8 = scmp.ne.s32.totalorder %s49_s24, %s87_s27  ;;  %p93_p10 = scmp.lt.s32.totalorder %s87_s27, %s87_s27 }
  0x18   :  { %p94_p11 = por %p93_p10, %p92_p9 }
  0x1a   :  { %p95_p12 = pnand %p94_p11, %p88_p8 }
  0x1c   :  { %98 = shalt.err (!%p95_p12)
}
  0x1d   :  { %s99_s1 = scalar_lea.hbm %s200_s3, 256 }
  0x1e   :  { %p100_p13 = scmp.ne.s32.totalorder %s200_s3, %s99_s1  ;;  %p103_p0 = scmp.lt.u32.totalorder %s99_s1, %s200_s3 }
  0x20   :  { %p105_p1 = pnand %p103_p0, %p100_p13 }
  0x22   :  { %108 = shalt.err (!%p105_p1)
}
  0x23   :  { %51 = dma.vmem_to_hbm [thread:$0]  %s49_s24, 256, %s200_s3, [#allocation9]   ;;  %v26_v1 = vld [vmem:[#allocation4] sm:$0xff]  ;;  %v27_v2 = vld [vmem:[#allocation4 + $0x8] sm:$0xff] }
  0x24   :  { %28 = vst [vmem:[#allocation7] sm:$0xff] %v26_v1  ;;  %29 = vst [vmem:[#allocation7 + $0x8] sm:$0xff] %v27_v2  ;;  %s109_s9 = scalar_lea.vmem %s39_s26, 256  ;;  %p114_p3 = scmp.lt.s32.totalorder %s39_s26, %s39_s26 }
  0x25   :  { %p110_p2 = scmp.ne.s32.totalorder %s39_s26, %s109_s9  ;;  %p115_p4 = scmp.lt.s32.totalorder %s109_s9, %s109_s9 }
  0x27   :  { %p116_p5 = por %p115_p4, %p114_p3 }
  0x29   :  { %p117_p6 = pnand %p116_p5, %p110_p2 }
  0x2b   :  { %120 = shalt.err (!%p117_p6)
}
  0x2c   :  { %s121_s12 = scalar_lea.hbm %s199_s2, 256 }
  0x2d   :  { %p122_p7 = scmp.ne.s32.totalorder %s199_s2, %s121_s12  ;;  %p125_p8 = scmp.lt.u32.totalorder %s121_s12, %s199_s2 }
  0x2f   :  { %p127_p9 = pnand %p125_p8, %p122_p7 }
  0x31   :  { %130 = shalt.err (!%p127_p9)
}
  0x32   :  { %41 = dma.vmem_to_hbm [thread:$0]  %s39_s26, 256, %s199_s2, [#allocation6]  }
  0x33   :  { %133 = dma.done.wait [#allocation6], 256  }
  0x34   :  { %134 = vsyncadd [#allocation6], 4294967040 }
  0x35   :  { %135 = dma.done.wait [#allocation9], 256  }
  0x36   :  { %136 = vsyncadd [#allocation9], 4294967040 }
  0x37   :  { %58 = vsyncpa [#allocation5], 1 }
  0x38   :  { %59 = vsyncpa [#allocation6], 1 }
  0x39   :  { %60 = vsyncpa [#allocation9], 1 }

</bundles_post_ra>
